<compile_context>
chip_gen: v6e
topology: v6e:2x2x1
jax: 0.10.0
libtpu: 0.0.40
codegen_flags: <defaults>
</compile_context>

<pallas_src>
import functools
import math

import jax
import jax.numpy as jnp
from jax.experimental import pallas as pl
from jax.experimental.pallas import tpu as pltpu


def _cdiv(a, b):
    return -(-a // b)


def _round_up(a, b):
    return _cdiv(a, b) * b


def _exceedance_sum_kernel(pred_ref, true_ref, sum_ref, *, threshold):
    """Accumulate exceedance counts over time tiles directly into the
    VMEM-resident output block.

    pred_ref/true_ref: (TB, TT, CK) input tiles (native dtype).
    sum_ref          : (TB, CK) f32 output block (same block for every t).
    """
    t = pl.program_id(2)

    @pl.when(t == 0)
    def _():
        sum_ref[...] = jnp.zeros_like(sum_ref)

    # Widen inside the kernel so subtract/abs/compare happen in f32 (parity
    # with the f32 PyTorch reference near the threshold).
    diff = pred_ref[...].astype(jnp.float32) - true_ref[...].astype(jnp.float32)
    binary = (jnp.abs(diff) >= threshold).astype(jnp.float32)
    sum_ref[...] += jnp.sum(binary, axis=1)  # reduce over the time-tile axis


def _choose_pack_factor(T, C):
    """Fold k consecutive time steps into the lane axis so k*C >= 128."""
    if C >= 128:
        return 1
    k_min = _cdiv(128, C)
    hi = min(T, 8 * k_min)
    divisors = [kk for kk in range(k_min, hi + 1) if T % kk == 0]
    for kk in divisors:                 # best: divides T and k*C % 128 == 0
        if (kk * C) % 128 == 0:
            return kk
    if divisors:                        # next: divides T (no time padding)
        return divisors[0]
    k_mult = 128 // math.gcd(C, 128)    # else: pad time, make k*C % 128 == 0
    return _round_up(k_min, k_mult)


def _vmem_budget_bytes():
    phys = 64 << 20  # conservative default = smallest per-core VMEM (v7x)
    try:
        info = pltpu.get_tpu_info()
        phys = int(getattr(info, "vmem_capacity_bytes", phys) or phys)
    except Exception:
        pass
    return (phys * 3) // 4


def exceedance_rate(pred, true, w_channel, threshold=0.01, tile_bytes=6 << 20):
    """Pallas TPU implementation of ExceedanceRate.forward.

    pred, true: (B, T, C) arrays (any float dtype; compare is done in f32)
    w_channel : (C,) float
    returns (weighted_er, er), each (B, C) float32.
    """
    B, T, C = pred.shape
    itemsize = jnp.dtype(pred.dtype).itemsize
    threshold = float(threshold)

    budget = _vmem_budget_bytes()
    tile_bytes = min(tile_bytes, budget // 6)  # 2 inputs x 2 buffers + headroom

    # ---- Lane-dense packing: (B, T, C) -> (B, Tp, CK) with CK = k*C >= 128.
    k = _choose_pack_factor(T, C)
    CK = k * C
    Tp = _cdiv(T, k)

    # ---- Batch tiling (output sublane axis): multiple of 8 or full extent.
    if B <= 8:
        TB, Bpad = B, B
    else:
        TB, Bpad = 8, _round_up(B, 8)

    # ---- Time tiling (reduction axis, innermost grid axis).
    tt_cap = max(8, tile_bytes // max(1, TB * CK * itemsize))
    if Tp <= tt_cap:
        TT = Tp                              # single tile: full time extent
    else:
        TT = max(8, (tt_cap // 8) * 8)       # multiple of 8: no masking needed
        Tp = _round_up(Tp, TT)
    n_time_tiles = Tp // TT

    # ---- Guarantee >= 2 steps on a "parallel" grid axis (v7x dual TC): when
    # the batch axis has a single tile, split the time reduction into two
    # independent super-chunks whose partial sums are added in the epilogue.
    n_split = 1
    if (Bpad // TB) < 2:
        if n_time_tiles == 1 and Tp >= 16:
            TT = _round_up(_cdiv(Tp, 2), 8)
            Tp = 2 * TT
            n_time_tiles = 2
        if n_time_tiles >= 2:
            if n_time_tiles % 2:
                Tp += TT
                n_time_tiles += 1
            n_split = 2
    tiles_per_split = n_time_tiles // n_split

    # ---- Pad (identical values in pred/true -> |diff| = 0) and fold.
    T_total = Tp * k
    if T_total != T:
        pad_t = T_total - T
        pred = jnp.pad(pred, ((0, 0), (0, pad_t), (0, 0)))
        true = jnp.pad(true, ((0, 0), (0, pad_t), (0, 0)))
    pred_p = pred.reshape(B, Tp, CK)   # contiguous reshape: no data movement
    true_p = true.reshape(B, Tp, CK)
    if Bpad != B:
        pred_p = jnp.pad(pred_p, ((0, Bpad - B), (0, 0), (0, 0)))
        true_p = jnp.pad(true_p, ((0, Bpad - B), (0, 0), (0, 0)))

    grid = (n_split, Bpad // TB, tiles_per_split)
    kernel = functools.partial(_exceedance_sum_kernel, threshold=threshold)

    in_tile_bytes = TB * TT * CK * itemsize
    out_tile_bytes = TB * CK * 4
    need = 4 * in_tile_bytes + 2 * out_tile_bytes  # 2 inputs x 2 bufs + output
    vmem_limit = int(min(budget, max(need + (8 << 20), 32 << 20)))
    vmem_limit = max(vmem_limit, need + (2 << 20))

    cost = pl.CostEstimate(
        flops=4 * B * T * C,                         # sub, abs, cmp, add
        transcendentals=0,
        bytes_accessed=2 * Bpad * Tp * CK * itemsize + n_split * Bpad * CK * 4)

    sums = pl.pallas_call(
        kernel,
        out_shape=jax.ShapeDtypeStruct((n_split, Bpad, CK), jnp.float32),
        grid=grid,
        in_specs=[
            pl.BlockSpec((TB, TT, CK),
                         lambda s, b, t: (b, s * tiles_per_split + t, 0)),
            pl.BlockSpec((TB, TT, CK),
                         lambda s, b, t: (b, s * tiles_per_split + t, 0)),
        ],
        out_specs=pl.BlockSpec((None, TB, CK), lambda s, b, t: (s, b, 0)),
        compiler_params=pltpu.CompilerParams(
            dimension_semantics=("parallel", "parallel", "arbitrary"),
            vmem_limit_bytes=vmem_limit),
        cost_estimate=cost,
    )(pred_p, true_p)

    # ---- Tiny O(B*C) epilogue: merge splits, drop padding, unfold, normalize.
    sums = sums.sum(axis=0)[:B]                    # (B, CK)
    counts = sums.reshape(B, k, C).sum(axis=1)     # (B, C)
    if threshold <= 0.0:
        # Padded steps have |diff| = 0, which counts when threshold <= 0.
        counts = counts - float(T_total - T)
    er = counts * (1.0 / T)
    weighted = er * w_channel.astype(jnp.float32).reshape(1, C)
    return weighted, er


def _reference(pred, true, w_channel, threshold=0.01):
    ae = jnp.abs(pred.astype(jnp.float32) - true.astype(jnp.float32))
    binary = (ae >= threshold).astype(jnp.float32)
    er = jnp.mean(binary, axis=1)
    return jnp.einsum("j,ij->ij", w_channel, er), er


if __name__ == "__main__":
    # Small deterministic example: batch=2, seq(time)=8, n_channel=4.
    B, T, C = 2, 8, 4
    key = jax.random.PRNGKey(0)
    k_pred, k_true = jax.random.split(key)
    pred = jax.random.normal(k_pred, (B, T, C), dtype=jnp.float32) * 0.02
    true = jax.random.normal(k_true, (B, T, C), dtype=jnp.float32) * 0.02

    # Deterministic parameter init, mirrors torch.ones(n_channel) / sum.
    w_channel = jnp.ones((C,), dtype=jnp.float32)
    w_channel = w_channel / jnp.sum(w_channel)

    weighted, er = exceedance_rate(pred, true, w_channel, threshold=0.01)
    jax.block_until_ready((weighted, er))

    ref_w, ref_er = _reference(pred, true, w_channel, threshold=0.01)
    assert jnp.allclose(weighted, ref_w, atol=1e-6), "weighted mismatch"
    assert jnp.allclose(er, ref_er, atol=1e-6), "er mismatch"

    print("KERNEL_OK")
</pallas_src>

<mosaic_0001>
module attributes {stable_mosaic.version = 11 : i64} {
  func.func @_exceedance_sum_kernel(%arg0: i32, %arg1: i32, %arg2: i32, %arg3: memref<2x1x128xf32, #tpu.memory_space<vmem>>, %arg4: memref<2x1x128xf32, #tpu.memory_space<vmem>>, %arg5: memref<1x2x128xf32, #tpu.memory_space<vmem>>) attributes {dimension_semantics = [#tpu.dimension_semantics<parallel>, #tpu.dimension_semantics<parallel>, #tpu.dimension_semantics<arbitrary>], iteration_bounds = array<i64: 1, 1, 1>, scalar_prefetch = 0 : i64, scratch_operands = 0 : i64, tpu.core_type = #tpu.core_type<tc>, window_params = [{transform_indices = @transform_0, window_bounds = array<i64: 2, 1, 128>}, {transform_indices = @transform_1, window_bounds = array<i64: 2, 1, 128>}, {transform_indices = @transform_2, window_bounds = array<i64: 1, 2, 128>}]} {
    %c0_i32 = arith.constant 0 : i32
    %0 = arith.cmpi eq, %arg2, %c0_i32 : i32
    %1 = arith.extui %0 : i1 to i32
    %c0_i32_0 = arith.constant 0 : i32
    %2 = arith.cmpi ne, %1, %c0_i32_0 : i32
    scf.if %2 {
      %cst_13 = arith.constant 0.000000e+00 : f32
      %18 = vector.broadcast %cst_13 : f32 to vector<2x128xf32>
      %c0_14 = arith.constant 0 : index
      %c0_15 = arith.constant 0 : index
      %c0_16 = arith.constant 0 : index
      %19 = vector.load %arg5[%c0_14, %c0_15, %c0_16] : memref<1x2x128xf32, #tpu.memory_space<vmem>>, vector<1x2x128xf32>
      %20 = vector.shape_cast %19 : vector<1x2x128xf32> to vector<2x128xf32>
      %21 = vector.shape_cast %18 : vector<2x128xf32> to vector<1x2x128xf32>
      tpu.vector_store %arg5[%c0_14, %c0_15, %c0_16], %21 {strides = array<i32>} : memref<1x2x128xf32, #tpu.memory_space<vmem>>, vector<1x2x128xf32>,
    } else {
    }
    %c0 = arith.constant 0 : index
    %c0_1 = arith.constant 0 : index
    %c0_2 = arith.constant 0 : index
    %3 = vector.load %arg3[%c0, %c0_1, %c0_2] : memref<2x1x128xf32, #tpu.memory_space<vmem>>, vector<2x1x128xf32>
    %c0_3 = arith.constant 0 : index
    %c0_4 = arith.constant 0 : index
    %c0_5 = arith.constant 0 : index
    %4 = vector.load %arg4[%c0_3, %c0_4, %c0_5] : memref<2x1x128xf32, #tpu.memory_space<vmem>>, vector<2x1x128xf32>
    %5 = arith.subf %3, %4 : vector<2x1x128xf32>
    %6 = math.absf %5 : vector<2x1x128xf32>
    %cst = arith.constant 0.00999999977 : f32
    %7 = vector.broadcast %cst : f32 to vector<2x1x128xf32>
    %8 = arith.cmpf oge, %6, %7 : vector<2x1x128xf32>
    %9 = arith.extui %8 : vector<2x1x128xi1> to vector<2x1x128xi32>
    %10 = arith.sitofp %9 : vector<2x1x128xi32> to vector<2x1x128xf32>
    %c0_6 = arith.constant 0 : index
    %c0_7 = arith.constant 0 : index
    %c0_8 = arith.constant 0 : index
    %11 = vector.load %arg5[%c0_6, %c0_7, %c0_8] : memref<1x2x128xf32, #tpu.memory_space<vmem>>, vector<1x2x128xf32>
    %12 = vector.shape_cast %11 : vector<1x2x128xf32> to vector<2x128xf32>
    %cst_9 = arith.constant dense<0.000000e+00> : vector<2x128xf32>
    %13 = vector.multi_reduction <add>, %10, %cst_9 [1] : vector<2x1x128xf32> to vector<2x128xf32>
    %14 = arith.addf %12, %13 : vector<2x128xf32>
    %c0_10 = arith.constant 0 : index
    %c0_11 = arith.constant 0 : index
    %c0_12 = arith.constant 0 : index
    %15 = vector.load %arg5[%c0_10, %c0_11, %c0_12] : memref<1x2x128xf32, #tpu.memory_space<vmem>>, vector<1x2x128xf32>
    %16 = vector.shape_cast %15 : vector<1x2x128xf32> to vector<2x128xf32>
    %17 = vector.shape_cast %14 : vector<2x128xf32> to vector<1x2x128xf32>
    tpu.vector_store %arg5[%c0_10, %c0_11, %c0_12], %17 {strides = array<i32>} : memref<1x2x128xf32, #tpu.memory_space<vmem>>, vector<1x2x128xf32>,
    return
  }
  func.func @transform_0(%arg0: i32, %arg1: i32, %arg2: i32) -> (i32, i32, i32) {
    %c1_i32 = arith.constant 1 : i32
    %0 = arith.muli %arg0, %c1_i32 : i32
    %1 = arith.addi %0, %arg2 : i32
    %c0_i32 = arith.constant 0 : i32
    %c0_i32_0 = arith.constant 0 : i32
    return %arg1, %1, %c0_i32 : i32, i32, i32
  }
  func.func @transform_1(%arg0: i32, %arg1: i32, %arg2: i32) -> (i32, i32, i32) {
    %c1_i32 = arith.constant 1 : i32
    %0 = arith.muli %arg0, %c1_i32 : i32
    %1 = arith.addi %0, %arg2 : i32
    %c0_i32 = arith.constant 0 : i32
    %c0_i32_0 = arith.constant 0 : i32
    return %arg1, %1, %c0_i32 : i32, i32, i32
  }
  func.func @transform_2(%arg0: i32, %arg1: i32, %arg2: i32) -> (i32, i32, i32) {
    %c0_i32 = arith.constant 0 : i32
    %c0_i32_0 = arith.constant 0 : i32
    return %arg0, %arg1, %c0_i32 : i32, i32, i32
  }
}

</mosaic_0001>

<bundles_post_ra>
// kernel: tpu_custom_call.1
= control target key start
LH: loop header
LB: loop body
LE: loop exit
PB: predicated region body
PF: predicated region fallthrough
CT: control target
= control target key end

     0   :  { %7 = vsyncpa [#allocation3], 0  ;;  %s212_s0 = inlined_call_operand.hbm [shape: f32[2,1,128], index: 0, kind: input, shape index: {}]   ;;  %s213_s1 = inlined_call_operand.hbm [shape: f32[2,1,128], index: 1, kind: input, shape index: {}]   ;;  %s214_s2 = inlined_call_operand.hbm [shape: f32[1,2,128], index: 2, kind: output, shape index: {}]  }
   0x1   :  { %8 = vsyncpa [#allocation6], 0 }
   0x2   :  { %9 = vsyncpa [#allocation4], 0  ;;  %s181_s9 = smov [#allocation2]  }
   0x3   :  { %s18_s10 = sshll.u32 %s181_s9, 4  ;;  %s19_s10 = int_to_ptr.vmem [resolvable:$true] %s18_s10 }
   0x4   :  { %s123_s11 = scalar_lea.vmem %s19_s10, 32  ;;  %p128_p1 = scmp.lt.s32.totalorder %s19_s10, %s19_s10 }
   0x5   :  { %p124_p0 = scmp.ne.s32.totalorder %s19_s10, %s123_s11  ;;  %p129_p2 = scmp.lt.s32.totalorder %s123_s11, %s123_s11 }
   0x7   :  { %p130_p3 = por %p129_p2, %p128_p1 }
   0x9   :  { %p131_p4 = pnand %p130_p3, %p124_p0 }
   0xb   :  { %134 = shalt.err (!%p131_p4)
}
   0xc   :  { %s182_s12 = smov 16   ;;  %s183_s13 = smov 1  }
   0xd   :  { %24 = dma.hbm_to_vmem [thread:$0]  %s212_s0, 32, %s19_s10, [#allocation3], %s182_s12, %s182_s12, %s183_s13  }
   0xe   :  { %s184_s16 = smov [#allocation5]  }
   0xf   :  { %s33_s17 = sshll.u32 %s184_s16, 4  ;;  %s34_s17 = int_to_ptr.vmem [resolvable:$true] %s33_s17 }
  0x10   :  { %s143_s18 = scalar_lea.vmem %s34_s17, 32  ;;  %p148_p6 = scmp.lt.s32.totalorder %s34_s17, %s34_s17 }
  0x11   :  { %p144_p5 = scmp.ne.s32.totalorder %s34_s17, %s143_s18  ;;  %p149_p7 = scmp.lt.s32.totalorder %s143_s18, %s143_s18 }
  0x13   :  { %p150_p8 = por %p149_p7, %p148_p6 }
  0x15   :  { %p151_p9 = pnand %p150_p8, %p144_p5 }
  0x17   :  { %154 = shalt.err (!%p151_p9)
}
  0x18   :  { %39 = dma.hbm_to_vmem [thread:$0]  %s213_s1, 32, %s34_s17, [#allocation6], %s182_s12, %s182_s12, %s183_s13  }
  0x19   :  { %175 = dma.done.wait [#allocation3], 32  }
  0x1a   :  { %176 = vsyncadd [#allocation3], 4294967264 }
  0x1b   :  { %177 = dma.done.wait [#allocation6], 32  }
  0x1c   :  { %178 = vsyncadd [#allocation6], 4294967264  ;;  %v185_v0 = vmov 0.0   ;;  %v186_v1 = vmov 1966171168   ;;  %v76_v3 = vlaneseq  ;;  %s187_s0 = smov [#allocation7]  }
  0x1d   :  { %52 = vst [vmem:[#allocation7] sm:$0x3] %v185_v0  ;;  %v74_v2 = vunpack.c.l.s4 %v186_v1  ;;  %v53_v4 = vld [vmem:[#allocation2] sm:$0x1]  ;;  %v54_v5 = vld [vmem:[#allocation2 + $0x1] sm:$0x1] }
  0x1e   :  { %v55_v6 = vld [vmem:[#allocation5] sm:$0x1]  ;;  %v56_v7 = vld [vmem:[#allocation5 + $0x1] sm:$0x1]  ;;  %v77_v11 = vshrl.u32 %v76_v3, 7  ;;  %s96_s1 = sshll.u32 %s187_s0, 4  ;;  %s97_s1 = int_to_ptr.vmem [resolvable:$true] %s96_s1 }
  0x1f   :  { %v57_v8 = vsub.f32 %v53_v4, %v55_v6  ;;  %v58_v9 = vsub.f32 %v54_v5, %v56_v7  ;;  %v75_v10 = vunpack.c.0.s8 %v74_v2  ;;  %s155_s21 = scalar_lea.vmem %s97_s1, 32  ;;  %p160_p11 = scmp.lt.s32.totalorder %s97_s1, %s97_s1 }
  0x20   :  { %p156_p10 = scmp.ne.s32.totalorder %s97_s1, %s155_s21  ;;  %p161_p12 = scmp.lt.s32.totalorder %s155_s21, %s155_s21 }
  0x21   :  { %v59_v12 = vand.u32 2147483647, %v57_v8  ;;  %v60_v13 = vand.u32 2147483647, %v58_v9  ;;  %v78_v15 = vsub.s32 %v75_v10, %v77_v11 }
  0x22   :  { %p162_p13 = por %p161_p12, %p160_p11 }
  0x23   :  { %vm61_vm0 = vcmp.ge.f32.partialorder %v59_v12, 0.01  ;;  %vm62_vm1 = vcmp.ge.f32.partialorder %v60_v13, 0.01 }
  0x24   :  { %v106_v14 = vsel %vm61_vm0, 1.0, %v185_v0  ;;  %v107_v16 = vsel %vm62_vm1, 1.0, %v185_v0  ;;  %v67_v19 = vld [vmem:[#allocation7] sm:$0x3]  ;;  %p163_p0 = pnand %p162_p13, %p156_p10 }
  0x25   :  { %v72_v17 = vcombine.low %v106_v14, %v107_v16 }
  0x27   :  { %v79_v18 = vrot.slane %v72_v17, %v78_v15 }
  0x29   :  { %v86_v20 = vrot.slane %v79_v18, %v78_v15 }
  0x2b   :  { %v88_v21 = vadd.f32 %v86_v20, %v67_v19 }
  0x2d   :  { %89 = vst [vmem:[#allocation7] sm:$0x3] %v88_v21 }
  0x2e   :  { %166 = shalt.err (!%p163_p0)
}
  0x2f   :  { %99 = dma.vmem_to_hbm [thread:$0]  %s97_s1, 32, %s214_s2, [#allocation4]  }
  0x30   :  { %179 = dma.done.wait [#allocation4], 32  }
  0x31   :  { %180 = vsyncadd [#allocation4], 4294967264 }
  0x32   :  { %103 = vsyncpa [#allocation3], 1 }
  0x33   :  { %104 = vsyncpa [#allocation6], 1 }
  0x34   :  { %105 = vsyncpa [#allocation4], 1 }

</bundles_post_ra>
